<compile_context>
chip_gen: v6e
topology: v6e:2x2x1
jax: 0.10.0
libtpu: 0.0.40
codegen_flags: <defaults>
</compile_context>

<pallas_src>
import jax
import jax.numpy as jnp
from jax import lax
from jax.experimental import pallas as pl
from jax.experimental.pallas import tpu as pltpu

LANE = 128  # padded feature width (full vreg lane dimension)


def mlp_kernel(x_ref,
               w1_ref, b1_ref,
               w2_ref, b2_ref,
               w3_ref, b3_ref,
               w4_ref, b4_ref,
               w5_ref, b5_ref,
               o_ref):
    """Whole forward pass of `net` for one batch tile.

    Hidden weights are bf16, zero-padded to 128 lanes; biases are f32 (1, 128).
    The output layer weight is stored transposed as an (8, 128) bf16 row block
    (only row 0 is real) so the logits can be produced lane-dense.
    """
    # no-op cast if the caller already supplied bf16 input
    h = x_ref[...].astype(jnp.bfloat16)

    # fc1 + ReLU
    h = jnp.dot(h, w1_ref[...], preferred_element_type=jnp.float32) + b1_ref[...]
    h = jnp.maximum(h, 0.0).astype(jnp.bfloat16)

    # hid1 + ReLU
    h = jnp.dot(h, w2_ref[...], preferred_element_type=jnp.float32) + b2_ref[...]
    h = jnp.maximum(h, 0.0).astype(jnp.bfloat16)

    # hid2 + ReLU
    h = jnp.dot(h, w3_ref[...], preferred_element_type=jnp.float32) + b3_ref[...]
    h = jnp.maximum(h, 0.0).astype(jnp.bfloat16)

    # hid4 + ReLU   (hid3 exists in the module but forward() never calls it)
    h = jnp.dot(h, w4_ref[...], preferred_element_type=jnp.float32) + b4_ref[...]
    h = jnp.maximum(h, 0.0).astype(jnp.bfloat16)

    # Output layer, computed transposed so the real logits land lane-dense:
    #   zt8[m, n] = sum_k w5[m, k] * h[n, k]   -> (8, TB); only row 0 is real.
    zt8 = lax.dot_general(
        w5_ref[...], h,
        dimension_numbers=(((1,), (1,)), ((), ())),
        preferred_element_type=jnp.float32)
    zt = zt8[0:1, :] + b5_ref[...]                 # (1, TB) logits, lane-dense

    # Stable sigmoid + clamp on only the TB real logits (not TB*128 elements);
    # one reciprocal, reused for both branches.
    e = jnp.exp(-jnp.abs(zt))
    r = 1.0 / (1.0 + e)
    y = jnp.where(zt >= 0.0, r, e * r)
    o_ref[0] = jnp.clip(y, 1e-06, 1.0 - 1e-06)     # (1, TB) f32 store


def _round_up(n, m):
    return (n + m - 1) // m * m


def net_forward(x, padded_params, *, tb=512):
    """Run the MLP.  Tiles the batch; weights stay resident in VMEM."""
    B, in_dim = x.shape
    # bf16 inputs need a 16-row sublane tile when the block doesn't span the
    # whole batch; f32 needs 8.
    align = 16 if x.dtype == jnp.bfloat16 else 8
    B_pad0 = _round_up(B, align)
    # Big tile to amortize per-step overhead and keep the MXU streaming, but
    # capped at ~half the batch so the "parallel" grid has >= 2 steps and both
    # v7x TensorCores get work (harmless on v5e/v6e).
    TB = min(tb, _round_up(pl.cdiv(B_pad0, 2), align))
    B_pad = _round_up(B_pad0, TB)
    if B_pad != B:
        # TODO(synk): ragged-tail masking would avoid this extra copy of x;
        # only triggers when B is not a multiple of the tile.
        x = jnp.pad(x, ((0, B_pad - B), (0, 0)))
    n_tiles = B_pad // TB

    flat = []
    for (w, b) in padded_params:
        flat += [w, b]

    def const_map(i):  # weights/biases: same block every grid step -> resident
        return (0, 0)

    in_specs = [pl.BlockSpec((TB, in_dim), lambda i: (i, 0))]
    for arr in flat:
        in_specs.append(pl.BlockSpec(arr.shape, const_map))

    out = pl.pallas_call(
        mlp_kernel,
        out_shape=jax.ShapeDtypeStruct((n_tiles, 1, TB), jnp.float32),
        grid=(n_tiles,),
        in_specs=in_specs,
        out_specs=pl.BlockSpec((1, 1, TB), lambda i: (i, 0, 0)),
        compiler_params=pltpu.CompilerParams(
            dimension_semantics=("parallel",),
        ),
    )(x, *flat)

    # Only B*4 bytes of real output; trivial reshape/slice.
    return out.reshape(B_pad)[:B].reshape(B, 1)


def init_params(key, input_size):
    """Logical (unpadded) f32 params, PyTorch nn.Linear-style init,
    stored transposed as (in, out) for direct x @ W use."""
    sizes = [(input_size, 100),  # fc1
             (100, 100),         # hid1
             (100, 100),         # hid2
             (100, 20),          # hid4
             (20, 1)]            # output
    # (hid3 has parameters in the PyTorch module but is never used in forward.)
    params = []
    for (fan_in, fan_out) in sizes:
        key, kw, kb = jax.random.split(key, 3)
        bound = 1.0 / jnp.sqrt(float(fan_in))
        w = jax.random.uniform(kw, (fan_in, fan_out), jnp.float32, -bound, bound)
        b = jax.random.uniform(kb, (fan_out,), jnp.float32, -bound, bound)
        params.append((w, b))
    return params


def pad_params(params, input_size):
    """Zero-pad layers to 128 lanes (weights -> bf16, biases -> f32).
    The output layer is stored transposed as an (8, 128) bf16 row block
    (row 0 real) with a (1, 1) f32 bias."""
    padded = []
    n = len(params)
    for li, (w, b) in enumerate(params):
        fan_in, fan_out = w.shape
        if li < n - 1:
            in_pad = input_size if li == 0 else LANE
            wp = jnp.zeros((in_pad, LANE), jnp.float32).at[:fan_in, :fan_out].set(w)
            bp = jnp.zeros((1, LANE), jnp.float32).at[0, :fan_out].set(b)
        else:
            wp = jnp.zeros((8, LANE), jnp.float32).at[0, :fan_in].set(w[:, 0])
            bp = jnp.zeros((1, 1), jnp.float32).at[0, 0].set(b[0])
        padded.append((wp.astype(jnp.bfloat16), bp))
    return padded


def reference_forward(x, params):
    """Pure-JAX reference doing the same bf16-operand / f32-accumulate math."""
    h = x.astype(jnp.float32)
    for i, (w, b) in enumerate(params):
        z = jnp.dot(h.astype(jnp.bfloat16), w.astype(jnp.bfloat16),
                    preferred_element_type=jnp.float32) + b
        h = jnp.maximum(z, 0.0) if i < len(params) - 1 else z
    e = jnp.exp(-jnp.abs(h))
    r = 1.0 / (1.0 + e)
    y = jnp.where(h >= 0.0, r, e * r)
    return jnp.clip(y, 1e-06, 1.0 - 1e-06)


if __name__ == "__main__":
    key = jax.random.PRNGKey(0)
    key, kx = jax.random.split(key)

    batch = 16
    input_size = 32
    x = jax.random.normal(kx, (batch, input_size), jnp.float32)

    params = init_params(key, input_size)
    padded = pad_params(params, input_size)

    # Kernel accepts bf16 input directly (halves input DMA); the reference
    # casts to bf16 internally, so the numerics match.
    out = net_forward(x.astype(jnp.bfloat16), padded)
    out = jax.block_until_ready(out)

    ref = reference_forward(x, params)
    assert out.shape == (batch, 1), out.shape
    assert jnp.allclose(out, ref, atol=1e-4, rtol=1e-4), (out, ref)

    print("KERNEL_OK")
</pallas_src>

<mosaic_0001>
module attributes {stable_mosaic.version = 11 : i64} {
  func.func @mlp_kernel(%arg0: i32, %arg1: memref<16x32xbf16, #tpu.memory_space<vmem>>, %arg2: memref<32x128xbf16, #tpu.memory_space<vmem>>, %arg3: memref<1x128xf32, #tpu.memory_space<vmem>>, %arg4: memref<128x128xbf16, #tpu.memory_space<vmem>>, %arg5: memref<1x128xf32, #tpu.memory_space<vmem>>, %arg6: memref<128x128xbf16, #tpu.memory_space<vmem>>, %arg7: memref<1x128xf32, #tpu.memory_space<vmem>>, %arg8: memref<128x128xbf16, #tpu.memory_space<vmem>>, %arg9: memref<1x128xf32, #tpu.memory_space<vmem>>, %arg10: memref<8x128xbf16, #tpu.memory_space<vmem>>, %arg11: memref<1x1xf32, #tpu.memory_space<vmem>>, %arg12: memref<1x1x16xf32, #tpu.memory_space<vmem>>) attributes {dimension_semantics = [#tpu.dimension_semantics<parallel>], iteration_bounds = array<i64: 1>, scalar_prefetch = 0 : i64, scratch_operands = 0 : i64, tpu.core_type = #tpu.core_type<tc>, window_params = [{transform_indices = @transform_0, window_bounds = array<i64: 16, 32>}, {pipeline_mode = #tpu.pipeline_mode<synchronous>, transform_indices = @transform_1, window_bounds = array<i64: 32, 128>}, {pipeline_mode = #tpu.pipeline_mode<synchronous>, transform_indices = @transform_2, window_bounds = array<i64: 1, 128>}, {pipeline_mode = #tpu.pipeline_mode<synchronous>, transform_indices = @transform_3, window_bounds = array<i64: 128, 128>}, {pipeline_mode = #tpu.pipeline_mode<synchronous>, transform_indices = @transform_4, window_bounds = array<i64: 1, 128>}, {pipeline_mode = #tpu.pipeline_mode<synchronous>, transform_indices = @transform_5, window_bounds = array<i64: 128, 128>}, {pipeline_mode = #tpu.pipeline_mode<synchronous>, transform_indices = @transform_6, window_bounds = array<i64: 1, 128>}, {pipeline_mode = #tpu.pipeline_mode<synchronous>, transform_indices = @transform_7, window_bounds = array<i64: 128, 128>}, {pipeline_mode = #tpu.pipeline_mode<synchronous>, transform_indices = @transform_8, window_bounds = array<i64: 1, 128>}, {pipeline_mode = #tpu.pipeline_mode<synchronous>, transform_indices = @transform_9, window_bounds = array<i64: 8, 128>}, {pipeline_mode = #tpu.pipeline_mode<synchronous>, transform_indices = @transform_10, window_bounds = array<i64: 1, 1>}, {transform_indices = @transform_11, window_bounds = array<i64: 1, 1, 16>}]} {
    %c0 = arith.constant 0 : index
    %c0_0 = arith.constant 0 : index
    %0 = vector.load %arg1[%c0, %c0_0] : memref<16x32xbf16, #tpu.memory_space<vmem>>, vector<16x32xbf16>
    %c0_1 = arith.constant 0 : index
    %c0_2 = arith.constant 0 : index
    %1 = vector.load %arg2[%c0_1, %c0_2] : memref<32x128xbf16, #tpu.memory_space<vmem>>, vector<32x128xbf16>
    %cst = arith.constant dense<0.000000e+00> : vector<16x128xf32>
    %2 = tpu.matmul %0, %1, %cst {dimension_numbers = #tpu.dot_dimension_numbers<[1], [0], [0], [1], [0, 0, 1, 1], [], []>} : vector<16x32xbf16>, vector<32x128xbf16>, vector<16x128xf32> -> vector<16x128xf32>
    %c0_3 = arith.constant 0 : index
    %c0_4 = arith.constant 0 : index
    %3 = vector.load %arg3[%c0_3, %c0_4] : memref<1x128xf32, #tpu.memory_space<vmem>>, vector<1x128xf32>
    %4 = vector.broadcast %3 : vector<1x128xf32> to vector<16x128xf32>
    %5 = arith.addf %2, %4 : vector<16x128xf32>
    %cst_5 = arith.constant 0.000000e+00 : f32
    %6 = vector.broadcast %cst_5 : f32 to vector<16x128xf32>
    %7 = arith.maximumf %5, %6 : vector<16x128xf32>
    %8 = arith.truncf %7 : vector<16x128xf32> to vector<16x128xbf16>
    %c0_6 = arith.constant 0 : index
    %c0_7 = arith.constant 0 : index
    %9 = vector.load %arg4[%c0_6, %c0_7] : memref<128x128xbf16, #tpu.memory_space<vmem>>, vector<128x128xbf16>
    %cst_8 = arith.constant dense<0.000000e+00> : vector<16x128xf32>
    %10 = tpu.matmul %8, %9, %cst_8 {dimension_numbers = #tpu.dot_dimension_numbers<[1], [0], [0], [1], [0, 0, 1, 1], [], []>} : vector<16x128xbf16>, vector<128x128xbf16>, vector<16x128xf32> -> vector<16x128xf32>
    %c0_9 = arith.constant 0 : index
    %c0_10 = arith.constant 0 : index
    %11 = vector.load %arg5[%c0_9, %c0_10] : memref<1x128xf32, #tpu.memory_space<vmem>>, vector<1x128xf32>
    %12 = vector.broadcast %11 : vector<1x128xf32> to vector<16x128xf32>
    %13 = arith.addf %10, %12 : vector<16x128xf32>
    %cst_11 = arith.constant 0.000000e+00 : f32
    %14 = vector.broadcast %cst_11 : f32 to vector<16x128xf32>
    %15 = arith.maximumf %13, %14 : vector<16x128xf32>
    %16 = arith.truncf %15 : vector<16x128xf32> to vector<16x128xbf16>
    %c0_12 = arith.constant 0 : index
    %c0_13 = arith.constant 0 : index
    %17 = vector.load %arg6[%c0_12, %c0_13] : memref<128x128xbf16, #tpu.memory_space<vmem>>, vector<128x128xbf16>
    %cst_14 = arith.constant dense<0.000000e+00> : vector<16x128xf32>
    %18 = tpu.matmul %16, %17, %cst_14 {dimension_numbers = #tpu.dot_dimension_numbers<[1], [0], [0], [1], [0, 0, 1, 1], [], []>} : vector<16x128xbf16>, vector<128x128xbf16>, vector<16x128xf32> -> vector<16x128xf32>
    %c0_15 = arith.constant 0 : index
    %c0_16 = arith.constant 0 : index
    %19 = vector.load %arg7[%c0_15, %c0_16] : memref<1x128xf32, #tpu.memory_space<vmem>>, vector<1x128xf32>
    %20 = vector.broadcast %19 : vector<1x128xf32> to vector<16x128xf32>
    %21 = arith.addf %18, %20 : vector<16x128xf32>
    %cst_17 = arith.constant 0.000000e+00 : f32
    %22 = vector.broadcast %cst_17 : f32 to vector<16x128xf32>
    %23 = arith.maximumf %21, %22 : vector<16x128xf32>
    %24 = arith.truncf %23 : vector<16x128xf32> to vector<16x128xbf16>
    %c0_18 = arith.constant 0 : index
    %c0_19 = arith.constant 0 : index
    %25 = vector.load %arg8[%c0_18, %c0_19] : memref<128x128xbf16, #tpu.memory_space<vmem>>, vector<128x128xbf16>
    %cst_20 = arith.constant dense<0.000000e+00> : vector<16x128xf32>
    %26 = tpu.matmul %24, %25, %cst_20 {dimension_numbers = #tpu.dot_dimension_numbers<[1], [0], [0], [1], [0, 0, 1, 1], [], []>} : vector<16x128xbf16>, vector<128x128xbf16>, vector<16x128xf32> -> vector<16x128xf32>
    %c0_21 = arith.constant 0 : index
    %c0_22 = arith.constant 0 : index
    %27 = vector.load %arg9[%c0_21, %c0_22] : memref<1x128xf32, #tpu.memory_space<vmem>>, vector<1x128xf32>
    %28 = vector.broadcast %27 : vector<1x128xf32> to vector<16x128xf32>
    %29 = arith.addf %26, %28 : vector<16x128xf32>
    %cst_23 = arith.constant 0.000000e+00 : f32
    %30 = vector.broadcast %cst_23 : f32 to vector<16x128xf32>
    %31 = arith.maximumf %29, %30 : vector<16x128xf32>
    %32 = arith.truncf %31 : vector<16x128xf32> to vector<16x128xbf16>
    %c0_24 = arith.constant 0 : index
    %c0_25 = arith.constant 0 : index
    %33 = vector.load %arg10[%c0_24, %c0_25] : memref<8x128xbf16, #tpu.memory_space<vmem>>, vector<8x128xbf16>
    %cst_26 = arith.constant dense<0.000000e+00> : vector<8x16xf32>
    %34 = tpu.matmul %33, %32, %cst_26 {dimension_numbers = #tpu.dot_dimension_numbers<[1], [1], [0], [0], [0, 0, 1, 0], [], []>} : vector<8x128xbf16>, vector<16x128xbf16>, vector<8x16xf32> -> vector<8x16xf32>
    %35 = vector.extract_strided_slice %34 {offsets = [0, 0], sizes = [1, 16], strides = [1, 1]} : vector<8x16xf32> to vector<1x16xf32>
    %c0_27 = arith.constant 0 : index
    %c0_28 = arith.constant 0 : index
    %36 = vector.load %arg11[%c0_27, %c0_28] : memref<1x1xf32, #tpu.memory_space<vmem>>, vector<1x1xf32>
    %37 = vector.broadcast %36 : vector<1x1xf32> to vector<1x16xf32>
    %38 = arith.addf %35, %37 : vector<1x16xf32>
    %39 = math.absf %38 : vector<1x16xf32>
    %cst_29 = arith.constant 0.000000e+00 : f32
    %40 = vector.broadcast %cst_29 : f32 to vector<1x16xf32>
    %41 = arith.subf %40, %39 : vector<1x16xf32>
    %42 = math.exp %41 : vector<1x16xf32>
    %cst_30 = arith.constant 1.000000e+00 : f32
    %43 = vector.broadcast %cst_30 : f32 to vector<1x16xf32>
    %44 = arith.addf %43, %42 : vector<1x16xf32>
    %cst_31 = arith.constant 1.000000e+00 : f32
    %45 = vector.broadcast %cst_31 : f32 to vector<1x16xf32>
    %46 = arith.divf %45, %44 : vector<1x16xf32>
    %cst_32 = arith.constant 0.000000e+00 : f32
    %47 = vector.broadcast %cst_32 : f32 to vector<1x16xf32>
    %48 = arith.cmpf oge, %38, %47 : vector<1x16xf32>
    %49 = arith.mulf %42, %46 : vector<1x16xf32>
    %50 = arith.select %48, %46, %49 : vector<1x16xi1>, vector<1x16xf32>
    %cst_33 = arith.constant 9.99999997E-7 : f32
    %cst_34 = arith.constant 0.999998986 : f32
    %51 = vector.broadcast %cst_33 : f32 to vector<1x16xf32>
    %52 = arith.maximumf %51, %50 : vector<1x16xf32>
    %53 = vector.broadcast %cst_34 : f32 to vector<1x16xf32>
    %54 = arith.minimumf %53, %52 : vector<1x16xf32>
    %c0_35 = arith.constant 0 : index
    %c0_36 = arith.constant 0 : index
    %c0_37 = arith.constant 0 : index
    %55 = vector.load %arg12[%c0_35, %c0_36, %c0_37] : memref<1x1x16xf32, #tpu.memory_space<vmem>>, vector<1x1x16xf32>
    %56 = vector.shape_cast %55 : vector<1x1x16xf32> to vector<1x16xf32>
    %57 = vector.shape_cast %54 : vector<1x16xf32> to vector<1x1x16xf32>
    tpu.vector_store %arg12[%c0_35, %c0_36, %c0_37], %57 {strides = array<i32>} : memref<1x1x16xf32, #tpu.memory_space<vmem>>, vector<1x1x16xf32>,
    return
  }
  func.func @transform_0(%arg0: i32) -> (i32, i32) {
    %c0_i32 = arith.constant 0 : i32
    %c0_i32_0 = arith.constant 0 : i32
    return %arg0, %c0_i32 : i32, i32
  }
  func.func @transform_1(%arg0: i32) -> (i32, i32) {
    %c0_i32 = arith.constant 0 : i32
    %c0_i32_0 = arith.constant 0 : i32
    %c0_i32_1 = arith.constant 0 : i32
    return %c0_i32, %c0_i32_0 : i32, i32
  }
  func.func @transform_2(%arg0: i32) -> (i32, i32) {
    %c0_i32 = arith.constant 0 : i32
    %c0_i32_0 = arith.constant 0 : i32
    %c0_i32_1 = arith.constant 0 : i32
    return %c0_i32, %c0_i32_0 : i32, i32
  }
  func.func @transform_3(%arg0: i32) -> (i32, i32) {
    %c0_i32 = arith.constant 0 : i32
    %c0_i32_0 = arith.constant 0 : i32
    %c0_i32_1 = arith.constant 0 : i32
    return %c0_i32, %c0_i32_0 : i32, i32
  }
  func.func @transform_4(%arg0: i32) -> (i32, i32) {
    %c0_i32 = arith.constant 0 : i32
    %c0_i32_0 = arith.constant 0 : i32
    %c0_i32_1 = arith.constant 0 : i32
    return %c0_i32, %c0_i32_0 : i32, i32
  }
  func.func @transform_5(%arg0: i32) -> (i32, i32) {
    %c0_i32 = arith.constant 0 : i32
    %c0_i32_0 = arith.constant 0 : i32
    %c0_i32_1 = arith.constant 0 : i32
    return %c0_i32, %c0_i32_0 : i32, i32
  }
  func.func @transform_6(%arg0: i32) -> (i32, i32) {
    %c0_i32 = arith.constant 0 : i32
    %c0_i32_0 = arith.constant 0 : i32
    %c0_i32_1 = arith.constant 0 : i32
    return %c0_i32, %c0_i32_0 : i32, i32
  }
  func.func @transform_7(%arg0: i32) -> (i32, i32) {
    %c0_i32 = arith.constant 0 : i32
    %c0_i32_0 = arith.constant 0 : i32
    %c0_i32_1 = arith.constant 0 : i32
    return %c0_i32, %c0_i32_0 : i32, i32
  }
  func.func @transform_8(%arg0: i32) -> (i32, i32) {
    %c0_i32 = arith.constant 0 : i32
    %c0_i32_0 = arith.constant 0 : i32
    %c0_i32_1 = arith.constant 0 : i32
    return %c0_i32, %c0_i32_0 : i32, i32
  }
  func.func @transform_9(%arg0: i32) -> (i32, i32) {
    %c0_i32 = arith.constant 0 : i32
    %c0_i32_0 = arith.constant 0 : i32
    %c0_i32_1 = arith.constant 0 : i32
    return %c0_i32, %c0_i32_0 : i32, i32
  }
  func.func @transform_10(%arg0: i32) -> (i32, i32) {
    %c0_i32 = arith.constant 0 : i32
    %c0_i32_0 = arith.constant 0 : i32
    %c0_i32_1 = arith.constant 0 : i32
    return %c0_i32, %c0_i32_0 : i32, i32
  }
  func.func @transform_11(%arg0: i32) -> (i32, i32, i32) {
    %c0_i32 = arith.constant 0 : i32
    %c0_i32_0 = arith.constant 0 : i32
    %c0_i32_1 = arith.constant 0 : i32
    return %arg0, %c0_i32, %c0_i32_0 : i32, i32, i32
  }
}

</mosaic_0001>

<bundles_post_ra>
// kernel: tpu_custom_call.1
= control target key start
LH: loop header
LB: loop body
LE: loop exit
PB: predicated region body
PF: predicated region fallthrough
CT: control target
= control target key end

     0   :  { %s1084_s0 = inlined_call_operand.hbm [shape: bf16[16,32], index: 0, kind: input, shape index: {}]   ;;  %s1085_s1 = inlined_call_operand.hbm [shape: bf16[32,128], index: 1, kind: input, shape index: {}]   ;;  %s1086_s2 = inlined_call_operand.vmem [shape: f32[1,128], index: 2, kind: input, shape index: {}]   ;;  %s1087_s3 = inlined_call_operand.hbm [shape: bf16[128,128], index: 3, kind: input, shape index: {}]   ;;  %s1088_s4 = inlined_call_operand.vmem [shape: f32[1,128], index: 4, kind: input, shape index: {}]   ;;  %s1089_s5 = inlined_call_operand.hbm [shape: bf16[128,128], index: 5, kind: input, shape index: {}]   ;;  %s1090_s6 = inlined_call_operand.vmem [shape: f32[1,128], index: 6, kind: input, shape index: {}]   ;;  %s1091_s7 = inlined_call_operand.hbm [shape: bf16[128,128], index: 7, kind: input, shape index: {}]   ;;  %s1092_s8 = inlined_call_operand.vmem [shape: f32[1,128], index: 8, kind: input, shape index: {}]   ;;  %s1093_s9 = inlined_call_operand.vmem [shape: bf16[8,128], index: 9, kind: input, shape index: {}]   ;;  %s1094_s10 = inlined_call_operand.<no memory space> [shape: f32[1,1], index: 10, kind: input, shape index: {}]   ;;  %s1095_s11 = inlined_call_operand.hbm [shape: f32[1,1,16], index: 11, kind: output, shape index: {}]  }
   0x1   :  { %v16_v0 = vstv %s1094_s10 }
   0x2   :  { %17 = vst [vmem:[#allocation2] sm:$0x1] %v16_v0 }
   0x3   :  { %18 = vsyncpa [#allocation4], 0 }
   0x4   :  { %19 = vsyncpa [#allocation7], 0 }
   0x5   :  { %20 = vsyncpa [#allocation10], 0 }
   0x6   :  { %21 = vsyncpa [#allocation5], 0  ;;  %s925_s19 = smov [#allocation6]   ;;  %s926_s21 = smov [#allocation9]  }
   0x7   :  { %s39_s20 = sshll.u32 %s925_s19, 4  ;;  %s67_s22 = sshll.u32 %s926_s21, 4  ;;  %s40_s20 = int_to_ptr.vmem [resolvable:$true] %s39_s20  ;;  %s68_s22 = int_to_ptr.vmem [resolvable:$true] %s67_s22 }
   0x8   :  { %s805_s23 = scalar_lea.vmem %s40_s20, 256  ;;  %p810_p1 = scmp.lt.s32.totalorder %s40_s20, %s40_s20 }
   0x9   :  { %p806_p0 = scmp.ne.s32.totalorder %s40_s20, %s805_s23  ;;  %p811_p2 = scmp.lt.s32.totalorder %s805_s23, %s805_s23 }
   0xb   :  { %p812_p3 = por %p811_p2, %p810_p1 }
   0xd   :  { %p813_p4 = pnand %p812_p3, %p806_p0 }
   0xf   :  { %816 = shalt.err (!%p813_p4)
}
  0x10   :  { %s927_s24 = smov 64   ;;  %s928_s10 = smov 4  }
  0x11   :  { %45 = dma.hbm_to_vmem [thread:$0]  %s1085_s1, 256, %s40_s20, [#allocation7], %s927_s24, %s927_s24, %s928_s10  }
  0x12   :  { %s825_s27 = scalar_lea.vmem %s68_s22, 1024  ;;  %p830_p6 = scmp.lt.s32.totalorder %s68_s22, %s68_s22 }
  0x13   :  { %p826_p5 = scmp.ne.s32.totalorder %s68_s22, %s825_s27  ;;  %p831_p7 = scmp.lt.s32.totalorder %s825_s27, %s825_s27 }
  0x15   :  { %p832_p8 = por %p831_p7, %p830_p6 }
  0x17   :  { %p833_p9 = pnand %p832_p8, %p826_p5 }
  0x19   :  { %836 = shalt.err (!%p833_p9)
}
  0x1a   :  { %73 = dma.hbm_to_vmem [thread:$0]  %s1089_s5, 1024, %s68_s22, [#allocation10], %s927_s24, %s927_s24, %s928_s10  }
  0x1b   :  { %s929_s30 = smov [#allocation3]   ;;  %s930_s13 = smov [#allocation8]  }
  0x1c   :  { %s27_s12 = sshll.u32 %s929_s30, 4  ;;  %s53_s14 = sshll.u32 %s930_s13, 4  ;;  %s28_s12 = int_to_ptr.vmem [resolvable:$true] %s27_s12  ;;  %s54_s14 = int_to_ptr.vmem [resolvable:$true] %s53_s14 }
  0x1d   :  { %s845_s1 = scalar_lea.vmem %s28_s12, 128  ;;  %p850_p11 = scmp.lt.s32.totalorder %s28_s12, %s28_s12 }
  0x1e   :  { %p846_p10 = scmp.ne.s32.totalorder %s28_s12, %s845_s1  ;;  %p851_p12 = scmp.lt.s32.totalorder %s845_s1, %s845_s1 }
  0x20   :  { %p852_p13 = por %p851_p12, %p850_p11 }
  0x22   :  { %p853_p0 = pnand %p852_p13, %p846_p10 }
  0x24   :  { %856 = shalt.err (!%p853_p0)
}
  0x25   :  { %33 = dma.hbm_to_vmem [thread:$0]  %s1084_s0, 128, %s28_s12, [#allocation4], %s927_s24, %s927_s24, %s928_s10  }
  0x26   :  { %s865_s5 = scalar_lea.vmem %s54_s14, 1024  ;;  %p870_p2 = scmp.lt.s32.totalorder %s54_s14, %s54_s14 }
  0x27   :  { %p866_p1 = scmp.ne.s32.totalorder %s54_s14, %s865_s5  ;;  %p871_p3 = scmp.lt.s32.totalorder %s865_s5, %s865_s5 }
  0x29   :  { %p872_p4 = por %p871_p3, %p870_p2 }
  0x2b   :  { %p873_p5 = pnand %p872_p4, %p866_p1 }
  0x2d   :  { %876 = shalt.err (!%p873_p5)
}
  0x2e   :  { %59 = dma.hbm_to_vmem [thread:$0]  %s1087_s3, 1024, %s54_s14, [#allocation7], %s927_s24, %s927_s24, %s928_s10  }
  0x2f   :  { %s931_s19 = smov [#allocation11]  }
  0x30   :  { %s81_s20 = sshll.u32 %s931_s19, 4  ;;  %s82_s20 = int_to_ptr.vmem [resolvable:$true] %s81_s20 }
  0x31   :  { %s885_s21 = scalar_lea.vmem %s82_s20, 1024  ;;  %p890_p7 = scmp.lt.s32.totalorder %s82_s20, %s82_s20 }
  0x32   :  { %p886_p6 = scmp.ne.s32.totalorder %s82_s20, %s885_s21  ;;  %p891_p8 = scmp.lt.s32.totalorder %s885_s21, %s885_s21 }
  0x34   :  { %p892_p9 = por %p891_p8, %p890_p7 }
  0x36   :  { %p893_p10 = pnand %p892_p9, %p886_p6 }
  0x38   :  { %896 = shalt.err (!%p893_p10)
}
  0x39   :  { %87 = dma.hbm_to_vmem [thread:$0]  %s1091_s7, 1024, %s82_s20, [#allocation10], %s927_s24, %s927_s24, %s928_s10  }
  0x3a   :  { %917 = dma.done.wait [#allocation4], 128  }
  0x3b   :  { %918 = vsyncadd [#allocation4], 4294967168 }
  0x3c   :  { %919 = dma.done.wait [#allocation7], 1280  }
  0x3d   :  { %920 = vsyncadd [#allocation7], 4294966016 }
  0x3e   :  { %921 = dma.done.wait [#allocation10], 2048  }
  0x3f   :  { %922 = vsyncadd [#allocation10], 4294965248  ;;  %v932_v1 = vmov 0.0   ;;  %vm933_vm0 = vmmov 0   ;;  %v766_v2 = vld [vmem:[#allocation6 + $0x8] sm:$0xff]   ;;  %v767_v3 = vld [vmem:[#allocation6] sm:$0xff]  }
  0x40   :  { %680 = vmatprep.subr.bf16.mxu0 %v932_v1  ;;  %684 = vmatprep.mubr.msk.bf16.mxu0 %vm933_vm0, %v932_v1  ;;  %v769_v4 = vld [vmem:[#allocation8 + $0x38] sm:$0xff]   ;;  %v768_v5 = vld [vmem:[#allocation3] sm:$0xff]   ;;  %v770_v6 = vld [vmem:[#allocation8 + $0x30] sm:$0xff]   ;;  %vm140_vm1 = vcmask 261120   ;;  %v934_v60 = vmov 0   ;;  %vm597_vm3 = vcmask 122880  }
  0x41   :  { %688 = vmatprep.subr.bf16.mxu1 %v932_v1  ;;  %704 = vmatprep.mubr.msk.bf16.mxu1 %vm933_vm0, %v932_v1  ;;  %v771_v7 = vld [vmem:[#allocation8 + $0x28] sm:$0xff]   ;;  %v772_v8 = vld [vmem:[#allocation8 + $0x20] sm:$0xff]   ;;  %v773_v9 = vld [vmem:[#allocation8 + $0x18] sm:$0xff]  }
  0x42   :  { %681 = vmatpush3.bf16.msra.mxu0 %v766_v2  ;;  %689 = vmatpush3.bf16.msra.mxu1 %v769_v4  ;;  %v774_v10 = vld [vmem:[#allocation8 + $0x10] sm:$0xff]   ;;  %v775_v11 = vld [vmem:[#allocation8 + $0x8] sm:$0xff]   ;;  %v776_v12 = vld [vmem:[#allocation8] sm:$0xff]  }
  0x43   :  { %682 = vmatprep.subr.bf16.mxu0 %v932_v1  ;;  %690 = vmatprep.subr.bf16.mxu1 %v932_v1  ;;  %v777_v13 = vld [vmem:[#allocation9 + $0x38] sm:$0xff]   ;;  %v778_v14 = vld [vmem:[#allocation9 + $0x30] sm:$0xff]   ;;  %v779_v15 = vld [vmem:[#allocation9 + $0x28] sm:$0xff]  }
  0x44   :  { %v780_v16 = vld [vmem:[#allocation9 + $0x20] sm:$0xff]   ;;  %v781_v17 = vld [vmem:[#allocation9 + $0x18] sm:$0xff]   ;;  %v782_v28 = vld [vmem:[#allocation9 + $0x10] sm:$0xff]   ;;  %765 = vset.pattern.permute.xlu0 %v934_v60 }
  0x45   :  { %v616_v18 = vld [vmem:[%s1086_s2] ss:$0 sm:$0xff]  ;;  %v783_v29 = vld [vmem:[#allocation9 + $0x8] sm:$0xff]   ;;  %v785_v31 = vld [vmem:[#allocation11 + $0x38] sm:$0xff]  }
  0x46   :  { %683 = vmatpush3.bf16.msra.mxu0 %v767_v3  ;;  %691 = vmatpush3.bf16.msra.mxu1 %v770_v6  ;;  %v784_v30 = vld [vmem:[#allocation9] sm:$0xff]   ;;  %v786_v32 = vld [vmem:[#allocation11 + $0x30] sm:$0xff]   ;;  %v787_v33 = vld [vmem:[#allocation11 + $0x28] sm:$0xff]  }
  0x47   :  { %708 = vmatprep.subr.bf16.mxu0 %v932_v1  ;;  %692 = vmatprep.subr.bf16.mxu1 %v932_v1  ;;  %v788_v34 = vld [vmem:[#allocation11 + $0x20] sm:$0xff]   ;;  %v789_v35 = vld [vmem:[#allocation11 + $0x18] sm:$0xff]   ;;  %v790_v46 = vld [vmem:[#allocation11 + $0x10] sm:$0xff]  }
  0x48   :  { %v621_v36 = vld [vmem:[%s1088_s4] ss:$0 sm:$0xff]  ;;  %v791_v47 = vld [vmem:[#allocation11 + $0x8] sm:$0xff]  }
  0x49   :  { %685 = vmatmul.mubr.msk.bf16.vlgmr.msra.gmra.mxu0 %vm140_vm1, %v768_v5  ;;  %v792_v48 = vld [vmem:[#allocation11] sm:$0xff]  }
  0x4a   :  { %724 = vmatprep.mubr.msk.bf16.mxu0 %vm933_vm0, %v932_v1  ;;  %693 = vmatpush3.bf16.msra.mxu1 %v771_v7  ;;  %v630_v49 = vld [vmem:[%s1090_s6] ss:$0 sm:$0xff] }
  0x4b   :  { %694 = vmatprep.subr.bf16.mxu1 %v932_v1  ;;  %709 = vmatpush3.bf16.msra.mxu0 %v777_v13  ;;  %v574_v59 = vld [vmem:[#allocation2] sm:$0x1] }
  0x4c   :  { %710 = vmatprep.subr.bf16.mxu0 %v932_v1  ;;  %577 = vperm.xlu0 %765, %v574_v59   ;;  %v639_v61 = vld [vmem:[%s1092_s8] ss:$0 sm:$0xff]  ;;  %s935_s8 = smov [#allocation12]  }
  0x4d   :  { %v533_v7 = vld [vmem:[%s1093_s9] sm:$0xf]  ;;  %s605_s9 = sshll.u32 %s935_s8, 4  ;;  %s606_s9 = int_to_ptr.vmem [resolvable:$true] %s605_s9 }
  0x4e   :  { %695 = vmatpush3.bf16.msra.mxu1 %v772_v8  ;;  %v580_v8 = vlaneseq  ;;  %s897_s27 = scalar_lea.vmem %s606_s9, 16  ;;  %s901_s28 = scalar_lea.vmem %s606_s9, 32 }
  0x4f   :  { %696 = vmatprep.subr.bf16.mxu1 %v932_v1  ;;  %711 = vmatpush3.bf16.msra.mxu0 %v778_v14  ;;  %p898_p11 = scmp.ne.s32.totalorder %s606_s9, %s897_s27  ;;  %p902_p12 = scmp.lt.s32.totalorder %s606_s9, %s606_s9 }
  0x50   :  { %712 = vmatprep.subr.bf16.mxu0 %v932_v1  ;;  %p903_p13 = scmp.lt.s32.totalorder %s901_s28, %s897_s27 }
  0x52   :  { %697 = vmatpush3.bf16.msra.mxu1 %v773_v9  ;;  %v581_v9 = vshrl.u32 %v580_v8, 7  ;;  %p904_p0 = por %p903_p13, %p902_p12 }
  0x53   :  { %698 = vmatprep.subr.bf16.mxu1 %v932_v1  ;;  %713 = vmatpush3.bf16.msra.mxu0 %v779_v15 }
  0x54   :  { %714 = vmatprep.subr.bf16.mxu0 %v932_v1  ;;  %p905_p1 = pnand %p904_p0, %p898_p11 }
  0x56   :  { %699 = vmatpush3.bf16.msra.mxu1 %v774_v10  ;;  %v582_v10 = vsub.s32 0, %v581_v9 }
  0x57   :  { %700 = vmatprep.subr.bf16.mxu1 %v932_v1  ;;  %715 = vmatpush3.bf16.msra.mxu0 %v780_v16 }
  0x58   :  { %716 = vmatprep.subr.bf16.mxu0 %v932_v1 }
  0x5a   :  { %701 = vmatpush3.bf16.msra.mxu1 %v775_v11 }
  0x5b   :  { %702 = vmatprep.subr.bf16.mxu1 %v932_v1  ;;  %717 = vmatpush3.bf16.msra.mxu0 %v781_v17 }
  0x5c   :  { %718 = vmatprep.subr.bf16.mxu0 %v932_v1 }
  0x5e   :  { %703 = vmatpush3.bf16.msra.mxu1 %v776_v12 }
  0x5f   :  { %728 = vmatprep.subr.bf16.mxu1 %v932_v1  ;;  %719 = vmatpush3.bf16.msra.mxu0 %v782_v28 }
  0x60   :  { %720 = vmatprep.subr.bf16.mxu0 %v932_v1 }
  0x63   :  { %721 = vmatpush3.bf16.msra.mxu0 %v783_v29 }
  0x64   :  { %722 = vmatprep.subr.bf16.mxu0 %v932_v1 }
  0x67   :  { %723 = vmatpush3.bf16.msra.mxu0 %v784_v30 }
  0x68   :  { %748 = vmatprep.subr.bf16.mxu0 %v932_v1 }
  0xc7   :  { %v578_v11 = vpop.permute.xlu0 %577 }
  0xc8   :  { %v583_v12 = vrot.slane %v578_v11, %v582_v10 }
 0x109   :  { %v178_v19 = vpop.f32.mrf.mxu0 }
 0x10a   :  { %v179_v21 = vadd.f32 %v616_v18, %v178_v19 }
 0x10b   :  { %v686_v20 = vpop.f32.mrf.mxu0 }
 0x10c   :  { %v185_v25 = vmax.f32 %v179_v21, 0.0 }
 0x10d   :  { %v181_v22 = vpop.f32.mrf.mxu0 }
 0x10e   :  { %v182_v23 = vadd.f32 %v616_v18, %v181_v22 }
 0x10f   :  { %v687_v24 = vpop.f32.mrf.mxu0 }
 0x110   :  { %v186_v26 = vmax.f32 %v182_v23, 0.0 }
 0x112   :  { %v187_v27 = vpack.c.bf16 %v186_v26, %v185_v25 }
 0x114   :  { %705 = vmatmul.mubr.bf16.vlgmr.msra.gmra.mxu1 %v187_v27 }
 0x115   :  { %744 = vmatprep.mubr.msk.bf16.mxu1 %vm933_vm0, %v932_v1  ;;  %729 = vmatpush3.bf16.msra.mxu1 %v785_v31 }
 0x116   :  { %730 = vmatprep.subr.bf16.mxu1 %v932_v1 }
 0x119   :  { %731 = vmatpush3.bf16.msra.mxu1 %v786_v32 }
 0x11a   :  { %732 = vmatprep.subr.bf16.mxu1 %v932_v1 }
 0x11d   :  { %733 = vmatpush3.bf16.msra.mxu1 %v787_v33 }
 0x11e   :  { %734 = vmatprep.subr.bf16.mxu1 %v932_v1 }
 0x121   :  { %735 = vmatpush3.bf16.msra.mxu1 %v788_v34 }
 0x122   :  { %736 = vmatprep.subr.bf16.mxu1 %v932_v1 }
 0x125   :  { %737 = vmatpush3.bf16.msra.mxu1 %v789_v35 }
 0x126   :  { %738 = vmatprep.subr.bf16.mxu1 %v932_v1 }
 0x129   :  { %739 = vmatpush3.bf16.msra.mxu1 %v790_v46 }
 0x12a   :  { %740 = vmatprep.subr.bf16.mxu1 %v932_v1 }
 0x12d   :  { %741 = vmatpush3.bf16.msra.mxu1 %v791_v47 }
 0x12e   :  { %742 = vmatprep.subr.bf16.mxu1 %v932_v1 }
 0x131   :  { %743 = vmatpush3.bf16.msra.mxu1 %v792_v48 }
 0x1d4   :  { %v293_v37 = vpop.f32.mrf.mxu1 }
 0x1d5   :  { %v294_v39 = vadd.f32 %v621_v36, %v293_v37 }
 0x1d6   :  { %v706_v38 = vpop.f32.mrf.mxu1 }
 0x1d7   :  { %v300_v43 = vmax.f32 %v294_v39, 0.0 }
 0x1d8   :  { %v296_v40 = vpop.f32.mrf.mxu1 }
 0x1d9   :  { %v297_v41 = vadd.f32 %v621_v36, %v296_v40 }
 0x1da   :  { %v707_v42 = vpop.f32.mrf.mxu1 }
 0x1db   :  { %v301_v44 = vmax.f32 %v297_v41, 0.0 }
 0x1dd   :  { %v302_v45 = vpack.c.bf16 %v301_v44, %v300_v43 }
 0x1df   :  { %725 = vmatmul.mubr.bf16.vlgmr.msra.gmra.mxu0 %v302_v45 }
 0x1e0   :  { %750 = vmatprep.mubr.msk.bf16.mxu0 %vm933_vm0, %v932_v1 }
 0x29f   :  { %v408_v50 = vpop.f32.mrf.mxu0 }
 0x2a0   :  { %v409_v52 = vadd.f32 %v630_v49, %v408_v50 }
 0x2a1   :  { %v726_v51 = vpop.f32.mrf.mxu0 }
 0x2a2   :  { %v415_v56 = vmax.f32 %v409_v52, 0.0 }
 0x2a3   :  { %v411_v53 = vpop.f32.mrf.mxu0 }
 0x2a4   :  { %v412_v54 = vadd.f32 %v630_v49, %v411_v53 }
 0x2a5   :  { %v727_v55 = vpop.f32.mrf.mxu0 }
 0x2a6   :  { %v416_v57 = vmax.f32 %v412_v54, 0.0 }
 0x2a8   :  { %v417_v58 = vpack.c.bf16 %v416_v57, %v415_v56 }
 0x2aa   :  { %745 = vmatmul.mubr.bf16.vlgmr.msra.gmra.mxu1 %v417_v58 }
 0x36a   :  { %v523_v62 = vpop.f32.mrf.mxu1 }
 0x36b   :  { %v524_v0 = vadd.f32 %v639_v61, %v523_v62 }
 0x36c   :  { %v746_v63 = vpop.f32.mrf.mxu1 }
 0x36d   :  { %v530_v4 = vmax.f32 %v524_v0, 0.0 }
 0x36e   :  { %v526_v1 = vpop.f32.mrf.mxu1 }
 0x36f   :  { %v527_v2 = vadd.f32 %v639_v61, %v526_v1 }
 0x370   :  { %v747_v3 = vpop.f32.mrf.mxu1 }
 0x371   :  { %v531_v5 = vmax.f32 %v527_v2, 0.0 }
 0x373   :  { %v532_v6 = vpack.c.bf16 %v531_v5, %v530_v4 }
 0x375   :  { %749 = vmatpush3.bf16.xpose.msra.mxu0 %v532_v6 }
 0x37c   :  { %751 = vmatmul.mubr.bf16.vlgmr.msra.gmra.mxu0 %v533_v7 }
 0x43c   :  { %v568_v13 = vpop.f32.mrf.mxu0 }
 0x43d   :  { %v584_v14 = vadd.f32 %v583_v12, %v568_v13 }
 0x43e   :  { %v752_v15 = vpop.f32.mrf.mxu0 }
 0x43f   :  { %v585_v16 = vand.u32 2147483647, %v584_v14  ;;  %vm592_vm2 = vcmp.ge.f32.partialorder %v584_v14, 0.0 }
 0x440   :  { %v571_v17 = vpop.f32.mrf.mxu0 }
 0x441   :  { %v586_v18 = vsub.f32 0.0, %v585_v16 }
 0x442   :  { %v753_v19 = vpop.f32.mrf.mxu0 }
 0x443   :  { %v587_v20 = vmul.f32 1.442695, %v586_v18 }
 0x445   :  { %793 = vpow2.f32 %v587_v20 }
 0x452   :  { %v794_v21 = vpop.eup %793 }
 0x453   :  { %v589_v22 = vadd.f32 1.0, %v794_v21 }
 0x455   :  { %795 = vrcp.f32 %v589_v22 }
 0x462   :  { %v796_v23 = vpop.eup %795 }
 0x463   :  { %v593_v24 = vmul.f32 %v796_v23, %v794_v21 }
 0x465   :  { %v594_v25 = vsel %vm592_vm2, %v796_v23, %v593_v24 }
 0x466   :  { %v595_v26 = vmax.f32 %v594_v25, 1e-06 }
 0x468   :  { %v596_v27 = vmin.f32 %v595_v26, 0.999999 }
 0x46a   :  { %598 = vst.msk [vmem:[#allocation12] sm:$0x1] %vm597_vm3, %v596_v27 }
 0x46b   :  { %908 = shalt.err (!%p905_p1)
}
 0x46c   :  { %608 = dma.vmem_to_hbm [thread:$0]  %s606_s9, 16, %s1095_s11, [#allocation5]  }
 0x46d   :  { %923 = dma.done.wait [#allocation5], 16  }
 0x46e   :  { %924 = vsyncadd [#allocation5], 4294967280 }
 0x46f   :  { %612 = vsyncpa [#allocation4], 1 }
 0x470   :  { %613 = vsyncpa [#allocation7], 1 }
 0x471   :  { %614 = vsyncpa [#allocation10], 1 }
 0x472   :  { %615 = vsyncpa [#allocation5], 1 }

</bundles_post_ra>
